<compile_context>
chip_gen: v5e
topology: v5e:2x2
jax: 0.10.0
libtpu: 0.0.40
codegen_flags: <defaults>
</compile_context>

<pallas_src>
import jax
import jax.numpy as jnp
from jax.experimental import pallas as pl
from jax.experimental.pallas import tpu as pltpu


def _round_up(x, m):
    return ((x + m - 1) // m) * m


# ---------------------------------------------------------------------------
# Kernel: fc1 (split concat, 2 MXU dots) -> ReLU -> fc2 (MXU) -> ReLU ->
#         q head as f32 lane-reduce -> (tb, 1) store.
# ---------------------------------------------------------------------------
def critic_kernel(s_ref, a_ref,
                  w1s_ref, w1a_ref, b1_ref,
                  w2_ref, b2_ref,
                  w3_ref, b3_ref,
                  out_ref):
    cdt = w1s_ref.dtype  # MXU operand dtype (f32 or bf16)

    xs = s_ref[...]
    xa = a_ref[...]
    if xs.dtype != cdt:   # no-op on the matched-dtype fast paths
        xs = xs.astype(cdt)
    if xa.dtype != cdt:
        xa = xa.astype(cdt)

    # fc1 on the (virtual) concat [state, action] -> ReLU  (f32 accumulate)
    h = (jnp.dot(xs, w1s_ref[...], preferred_element_type=jnp.float32)
         + jnp.dot(xa, w1a_ref[...], preferred_element_type=jnp.float32)
         + b1_ref[...])
    h = jnp.maximum(h, 0.0)

    # fc2 -> ReLU  (f32 accumulate)
    h = jnp.dot(h.astype(cdt), w2_ref[...],
                preferred_element_type=jnp.float32) + b2_ref[...]
    h = jnp.maximum(h, 0.0)

    # q head: single output column -> VPU multiply + XLU lane reduce, all f32.
    q = jnp.sum(h * w3_ref[...], axis=-1, keepdims=True) + b3_ref[...]
    out_ref[...] = q


# ---------------------------------------------------------------------------
# Wrapper
# ---------------------------------------------------------------------------
def critic_forward(state, action, kparams, *, block_b=2048):
    """state: (B, input_dims), action: (B, n_agents*n_actions); f32 or bf16."""
    B, sd = state.shape
    ad = action.shape[1]

    # Batch tile: big enough to amortize per-step pipeline overhead, capped so
    # there are >= 2 grid steps (v7x dual TensorCore) and VMEM stays small.
    # No padding of B: the ragged last block is handled by Pallas.
    tb = min(block_b, max(8, _round_up(pl.cdiv(B, 2), 8)))
    grid = (pl.cdiv(B, tb),)

    def row_spec(d):
        return pl.BlockSpec((tb, d), lambda i: (i, 0))

    def const_spec(shape):
        return pl.BlockSpec(shape, lambda i: (0, 0))

    out = pl.pallas_call(
        critic_kernel,
        out_shape=jax.ShapeDtypeStruct((B, 1), jnp.float32),
        grid=grid,
        in_specs=[
            row_spec(sd),                          # state rows (pipelined)
            row_spec(ad),                          # action rows (pipelined)
            const_spec(kparams["w1s"].shape),      # weights/biases: resident
            const_spec(kparams["w1a"].shape),
            const_spec(kparams["b1"].shape),
            const_spec(kparams["w2"].shape),
            const_spec(kparams["b2"].shape),
            const_spec(kparams["w3"].shape),
            const_spec(kparams["b3"].shape),
        ],
        out_specs=pl.BlockSpec((tb, 1), lambda i: (i, 0)),
        compiler_params=pltpu.CompilerParams(
            dimension_semantics=("parallel",)),
    )(state, action,
      kparams["w1s"], kparams["w1a"], kparams["b1"],
      kparams["w2"], kparams["b2"],
      kparams["w3"], kparams["b3"])

    return out


# ---------------------------------------------------------------------------
# Parameter construction (PyTorch nn.Linear default init) + kernel packing
# ---------------------------------------------------------------------------
def _linear_default(key, out_dim, in_dim):
    # nn.Linear default: U(-1/sqrt(in), 1/sqrt(in)) for W and b.
    kw, kb = jax.random.split(key)
    bound = 1.0 / jnp.sqrt(jnp.float32(in_dim))
    w = jax.random.uniform(kw, (out_dim, in_dim), jnp.float32, -bound, bound)
    b = jax.random.uniform(kb, (out_dim,), jnp.float32, -bound, bound)
    return w, b


def init_params(key, input_dims, n_agents, n_actions, fc1_dims, fc2_dims):
    in_dim = input_dims + n_agents * n_actions
    k1, k2, k3 = jax.random.split(key, 3)
    w1, b1 = _linear_default(k1, fc1_dims, in_dim)
    w2, b2 = _linear_default(k2, fc2_dims, fc1_dims)
    w3, b3 = _linear_default(k3, 1, fc2_dims)
    return {"w1": w1, "b1": b1, "w2": w2, "b2": b2, "w3": w3, "b3": b3}


def pack_params(p, input_dims, compute_dtype=jnp.float32):
    """Transpose to (in, out), zero-pad hidden dims to 128 lanes, split the fc1
    weight into state/action blocks, cast MXU operands to compute_dtype.
    The q head stays 1-wide and f32 (computed as a lane reduce in-kernel)."""
    h1 = p["w1"].shape[0]
    h2 = p["w2"].shape[0]
    h1p = _round_up(h1, 128)
    h2p = _round_up(h2, 128)

    w1 = jnp.pad(p["w1"].T, ((0, 0), (0, h1p - h1)))        # (in_dim, h1p)
    w1s = w1[:input_dims, :]
    w1a = w1[input_dims:, :]
    b1 = jnp.pad(p["b1"], (0, h1p - h1)).reshape(1, h1p)

    w2 = jnp.pad(p["w2"].T, ((0, h1p - h1), (0, h2p - h2)))  # (h1p, h2p)
    b2 = jnp.pad(p["b2"], (0, h2p - h2)).reshape(1, h2p)

    w3 = jnp.pad(p["w3"], ((0, 0), (0, h2p - h2)))            # (1, h2p) row
    b3 = p["b3"].reshape(1, 1)

    cd = compute_dtype
    return {
        "w1s": w1s.astype(cd), "w1a": w1a.astype(cd), "b1": b1,  # biases f32
        "w2": w2.astype(cd), "b2": b2,
        "w3": w3, "b3": b3,                                      # q head f32
    }


def reference_forward(state, action, p):
    x = jnp.concatenate([state, action], axis=1)
    h = jnp.maximum(x @ p["w1"].T + p["b1"], 0.0)
    h = jnp.maximum(h @ p["w2"].T + p["b2"], 0.0)
    return h @ p["w3"].T + p["b3"]


# TODO(synk): Adam optimizer and checkpoint save/load from the PyTorch module
# are training / IO utilities with no kernel equivalent; only forward() is
# implemented here.

if __name__ == "__main__":
    input_dims = 16
    n_agents = 2
    n_actions = 4
    fc1_dims = 64
    fc2_dims = 64

    key = jax.random.PRNGKey(0)
    kp, ks, ka = jax.random.split(key, 3)
    raw = init_params(kp, input_dims, n_agents, n_actions, fc1_dims, fc2_dims)

    # --- f32 path, small batch (single grid step) -------------------------
    B = 8
    state = jax.random.normal(ks, (B, input_dims), dtype=jnp.float32)
    action = jax.random.normal(ka, (B, n_agents * n_actions), dtype=jnp.float32)
    ref = reference_forward(state, action, raw)

    kparams_f32 = pack_params(raw, input_dims, jnp.float32)
    q_f32 = jax.block_until_ready(critic_forward(state, action, kparams_f32))
    assert q_f32.shape == (B, 1)
    assert jnp.allclose(q_f32, ref, atol=1e-5, rtol=1e-5), "f32 mismatch vs reference"

    # --- f32 path, ragged batch with 2 grid steps (no batch padding) ------
    B2 = 30
    s2 = jax.random.normal(jax.random.PRNGKey(1), (B2, input_dims), jnp.float32)
    a2 = jax.random.normal(jax.random.PRNGKey(2), (B2, n_agents * n_actions), jnp.float32)
    ref2 = reference_forward(s2, a2, raw)
    q2 = jax.block_until_ready(critic_forward(s2, a2, kparams_f32))
    assert q2.shape == (B2, 1)
    assert jnp.allclose(q2, ref2, atol=1e-5, rtol=1e-5), "ragged-batch mismatch vs reference"

    # --- bf16 fast path: inputs already bf16 in HBM, f32 accumulation ------
    kparams_bf16 = pack_params(raw, input_dims, jnp.bfloat16)
    q_bf16 = jax.block_until_ready(
        critic_forward(state.astype(jnp.bfloat16),
                       action.astype(jnp.bfloat16), kparams_bf16))
    assert q_bf16.shape == (B, 1)
    assert jnp.allclose(q_bf16, ref, atol=5e-2, rtol=5e-2), "bf16 mismatch vs reference"

    print("KERNEL_OK")
</pallas_src>

<mosaic_0001>
module attributes {stable_mosaic.version = 11 : i64} {
  func.func @critic_kernel(%arg0: i32, %arg1: memref<8x16xf32, #tpu.memory_space<vmem>>, %arg2: memref<8x8xf32, #tpu.memory_space<vmem>>, %arg3: memref<16x128xf32, #tpu.memory_space<vmem>>, %arg4: memref<8x128xf32, #tpu.memory_space<vmem>>, %arg5: memref<1x128xf32, #tpu.memory_space<vmem>>, %arg6: memref<128x128xf32, #tpu.memory_space<vmem>>, %arg7: memref<1x128xf32, #tpu.memory_space<vmem>>, %arg8: memref<1x128xf32, #tpu.memory_space<vmem>>, %arg9: memref<1x1xf32, #tpu.memory_space<vmem>>, %arg10: memref<8x1xf32, #tpu.memory_space<vmem>>) attributes {dimension_semantics = [#tpu.dimension_semantics<parallel>], iteration_bounds = array<i64: 1>, scalar_prefetch = 0 : i64, scratch_operands = 0 : i64, tpu.core_type = #tpu.core_type<tc>, window_params = [{transform_indices = @transform_0, window_bounds = array<i64: 8, 16>}, {transform_indices = @transform_1, window_bounds = array<i64: 8, 8>}, {pipeline_mode = #tpu.pipeline_mode<synchronous>, transform_indices = @transform_2, window_bounds = array<i64: 16, 128>}, {pipeline_mode = #tpu.pipeline_mode<synchronous>, transform_indices = @transform_3, window_bounds = array<i64: 8, 128>}, {pipeline_mode = #tpu.pipeline_mode<synchronous>, transform_indices = @transform_4, window_bounds = array<i64: 1, 128>}, {pipeline_mode = #tpu.pipeline_mode<synchronous>, transform_indices = @transform_5, window_bounds = array<i64: 128, 128>}, {pipeline_mode = #tpu.pipeline_mode<synchronous>, transform_indices = @transform_6, window_bounds = array<i64: 1, 128>}, {pipeline_mode = #tpu.pipeline_mode<synchronous>, transform_indices = @transform_7, window_bounds = array<i64: 1, 128>}, {pipeline_mode = #tpu.pipeline_mode<synchronous>, transform_indices = @transform_8, window_bounds = array<i64: 1, 1>}, {transform_indices = @transform_9, window_bounds = array<i64: 8, 1>}]} {
    %c0 = arith.constant 0 : index
    %c0_0 = arith.constant 0 : index
    %0 = vector.load %arg1[%c0, %c0_0] : memref<8x16xf32, #tpu.memory_space<vmem>>, vector<8x16xf32>
    %c0_1 = arith.constant 0 : index
    %c0_2 = arith.constant 0 : index
    %1 = vector.load %arg2[%c0_1, %c0_2] : memref<8x8xf32, #tpu.memory_space<vmem>>, vector<8x8xf32>
    %c0_3 = arith.constant 0 : index
    %c0_4 = arith.constant 0 : index
    %2 = vector.load %arg3[%c0_3, %c0_4] : memref<16x128xf32, #tpu.memory_space<vmem>>, vector<16x128xf32>
    %cst = arith.constant dense<0.000000e+00> : vector<8x128xf32>
    %3 = tpu.matmul %0, %2, %cst {dimension_numbers = #tpu.dot_dimension_numbers<[1], [0], [0], [1], [0, 0, 1, 1], [], []>} : vector<8x16xf32>, vector<16x128xf32>, vector<8x128xf32> -> vector<8x128xf32>
    %c0_5 = arith.constant 0 : index
    %c0_6 = arith.constant 0 : index
    %4 = vector.load %arg4[%c0_5, %c0_6] : memref<8x128xf32, #tpu.memory_space<vmem>>, vector<8x128xf32>
    %cst_7 = arith.constant dense<0.000000e+00> : vector<8x128xf32>
    %5 = tpu.matmul %1, %4, %cst_7 {dimension_numbers = #tpu.dot_dimension_numbers<[1], [0], [0], [1], [0, 0, 1, 1], [], []>} : vector<8x8xf32>, vector<8x128xf32>, vector<8x128xf32> -> vector<8x128xf32>
    %6 = arith.addf %3, %5 : vector<8x128xf32>
    %c0_8 = arith.constant 0 : index
    %c0_9 = arith.constant 0 : index
    %7 = vector.load %arg5[%c0_8, %c0_9] : memref<1x128xf32, #tpu.memory_space<vmem>>, vector<1x128xf32>
    %8 = vector.broadcast %7 : vector<1x128xf32> to vector<8x128xf32>
    %9 = arith.addf %6, %8 : vector<8x128xf32>
    %cst_10 = arith.constant 0.000000e+00 : f32
    %10 = vector.broadcast %cst_10 : f32 to vector<8x128xf32>
    %11 = arith.maximumf %9, %10 : vector<8x128xf32>
    %c0_11 = arith.constant 0 : index
    %c0_12 = arith.constant 0 : index
    %12 = vector.load %arg6[%c0_11, %c0_12] : memref<128x128xf32, #tpu.memory_space<vmem>>, vector<128x128xf32>
    %cst_13 = arith.constant dense<0.000000e+00> : vector<8x128xf32>
    %13 = tpu.matmul %11, %12, %cst_13 {dimension_numbers = #tpu.dot_dimension_numbers<[1], [0], [0], [1], [0, 0, 1, 1], [], []>} : vector<8x128xf32>, vector<128x128xf32>, vector<8x128xf32> -> vector<8x128xf32>
    %c0_14 = arith.constant 0 : index
    %c0_15 = arith.constant 0 : index
    %14 = vector.load %arg7[%c0_14, %c0_15] : memref<1x128xf32, #tpu.memory_space<vmem>>, vector<1x128xf32>
    %15 = vector.broadcast %14 : vector<1x128xf32> to vector<8x128xf32>
    %16 = arith.addf %13, %15 : vector<8x128xf32>
    %cst_16 = arith.constant 0.000000e+00 : f32
    %17 = vector.broadcast %cst_16 : f32 to vector<8x128xf32>
    %18 = arith.maximumf %16, %17 : vector<8x128xf32>
    %c0_17 = arith.constant 0 : index
    %c0_18 = arith.constant 0 : index
    %19 = vector.load %arg8[%c0_17, %c0_18] : memref<1x128xf32, #tpu.memory_space<vmem>>, vector<1x128xf32>
    %20 = vector.broadcast %19 : vector<1x128xf32> to vector<8x128xf32>
    %21 = arith.mulf %18, %20 : vector<8x128xf32>
    %cst_19 = arith.constant dense<0.000000e+00> : vector<8xf32>
    %22 = vector.multi_reduction <add>, %21, %cst_19 [1] : vector<8x128xf32> to vector<8xf32>
    %23 = vector.shape_cast %22 : vector<8xf32> to vector<8x1xf32>
    %c0_20 = arith.constant 0 : index
    %c0_21 = arith.constant 0 : index
    %24 = vector.load %arg9[%c0_20, %c0_21] : memref<1x1xf32, #tpu.memory_space<vmem>>, vector<1x1xf32>
    %25 = vector.broadcast %24 : vector<1x1xf32> to vector<8x1xf32>
    %26 = arith.addf %23, %25 : vector<8x1xf32>
    %c0_22 = arith.constant 0 : index
    %c0_23 = arith.constant 0 : index
    %27 = vector.load %arg10[%c0_22, %c0_23] : memref<8x1xf32, #tpu.memory_space<vmem>>, vector<8x1xf32>
    tpu.vector_store %arg10[%c0_22, %c0_23], %26 {strides = array<i32>} : memref<8x1xf32, #tpu.memory_space<vmem>>, vector<8x1xf32>,
    return
  }
  func.func @transform_0(%arg0: i32) -> (i32, i32) {
    %c0_i32 = arith.constant 0 : i32
    %c0_i32_0 = arith.constant 0 : i32
    return %arg0, %c0_i32 : i32, i32
  }
  func.func @transform_1(%arg0: i32) -> (i32, i32) {
    %c0_i32 = arith.constant 0 : i32
    %c0_i32_0 = arith.constant 0 : i32
    return %arg0, %c0_i32 : i32, i32
  }
  func.func @transform_2(%arg0: i32) -> (i32, i32) {
    %c0_i32 = arith.constant 0 : i32
    %c0_i32_0 = arith.constant 0 : i32
    %c0_i32_1 = arith.constant 0 : i32
    return %c0_i32, %c0_i32_0 : i32, i32
  }
  func.func @transform_3(%arg0: i32) -> (i32, i32) {
    %c0_i32 = arith.constant 0 : i32
    %c0_i32_0 = arith.constant 0 : i32
    %c0_i32_1 = arith.constant 0 : i32
    return %c0_i32, %c0_i32_0 : i32, i32
  }
  func.func @transform_4(%arg0: i32) -> (i32, i32) {
    %c0_i32 = arith.constant 0 : i32
    %c0_i32_0 = arith.constant 0 : i32
    %c0_i32_1 = arith.constant 0 : i32
    return %c0_i32, %c0_i32_0 : i32, i32
  }
  func.func @transform_5(%arg0: i32) -> (i32, i32) {
    %c0_i32 = arith.constant 0 : i32
    %c0_i32_0 = arith.constant 0 : i32
    %c0_i32_1 = arith.constant 0 : i32
    return %c0_i32, %c0_i32_0 : i32, i32
  }
  func.func @transform_6(%arg0: i32) -> (i32, i32) {
    %c0_i32 = arith.constant 0 : i32
    %c0_i32_0 = arith.constant 0 : i32
    %c0_i32_1 = arith.constant 0 : i32
    return %c0_i32, %c0_i32_0 : i32, i32
  }
  func.func @transform_7(%arg0: i32) -> (i32, i32) {
    %c0_i32 = arith.constant 0 : i32
    %c0_i32_0 = arith.constant 0 : i32
    %c0_i32_1 = arith.constant 0 : i32
    return %c0_i32, %c0_i32_0 : i32, i32
  }
  func.func @transform_8(%arg0: i32) -> (i32, i32) {
    %c0_i32 = arith.constant 0 : i32
    %c0_i32_0 = arith.constant 0 : i32
    %c0_i32_1 = arith.constant 0 : i32
    return %c0_i32, %c0_i32_0 : i32, i32
  }
  func.func @transform_9(%arg0: i32) -> (i32, i32) {
    %c0_i32 = arith.constant 0 : i32
    %c0_i32_0 = arith.constant 0 : i32
    return %arg0, %c0_i32 : i32, i32
  }
}

</mosaic_0001>

<bundles_post_ra>
// kernel: tpu_custom_call.1
= control target key start
LH: loop header
LB: loop body
LE: loop exit
PB: predicated region body
PF: predicated region fallthrough
CT: control target
= control target key end

     0   :  { %s453_s0 = inlined_call_operand.hbm [shape: f32[8,16], index: 0, kind: input, shape index: {}]   ;;  %s454_s1 = inlined_call_operand.hbm [shape: f32[8,8], index: 1, kind: input, shape index: {}]   ;;  %s455_s2 = inlined_call_operand.hbm [shape: f32[16,128], index: 2, kind: input, shape index: {}]   ;;  %s456_s3 = inlined_call_operand.hbm [shape: f32[8,128], index: 3, kind: input, shape index: {}]   ;;  %s457_s4 = inlined_call_operand.vmem [shape: f32[1,128], index: 4, kind: input, shape index: {}]   ;;  %s458_s5 = inlined_call_operand.hbm [shape: f32[128,128], index: 5, kind: input, shape index: {}]   ;;  %s459_s6 = inlined_call_operand.vmem [shape: f32[1,128], index: 6, kind: input, shape index: {}]   ;;  %s460_s7 = inlined_call_operand.vmem [shape: f32[1,128], index: 7, kind: input, shape index: {}]   ;;  %s461_s8 = inlined_call_operand.<no memory space> [shape: f32[1,1], index: 8, kind: input, shape index: {}]   ;;  %s462_s9 = inlined_call_operand.vmem [shape: f32[8,1], index: 9, kind: output, shape index: {}]  }
   0x1   :  { %v14_v0 = vstv %s461_s8 }
   0x2   :  { %15 = vst [vmem:[#allocation2] sm:$0x1] %v14_v0 }
   0x3   :  { %16 = vsyncpa [#allocation4], 0 }
   0x4   :  { %17 = vsyncpa [#allocation6], 0  ;;  %s35_s13 = sshll.u32 %s454_s1, 4  ;;  %s36_s13 = int_to_ptr.hbm [resolvable:$true] %s35_s13 }
   0x5   :  { %18 = vsyncpa [#allocation9], 0  ;;  %s366_s14 = smov [#allocation5]   ;;  %s59_s18 = sshll.u32 %s456_s3, 4  ;;  %s60_s18 = int_to_ptr.hbm [resolvable:$true] %s59_s18 }
   0x6   :  { %s37_s15 = sshll.u32 %s366_s14, 4  ;;  %s367_s19 = smov [#allocation8]   ;;  %s38_s15 = int_to_ptr.vmem [resolvable:$true] %s37_s15 }
   0x7   :  { %40 = dma.hbm_to_vmem [thread:$0]  %s36_s13, 128, %s38_s15, [#allocation6]  }
   0x8   :  { %s61_s8 = sshll.u32 %s367_s19, 4  ;;  %s24_s22 = sshll.u32 %s453_s0, 4  ;;  %s62_s8 = int_to_ptr.vmem [resolvable:$true] %s61_s8  ;;  %s25_s22 = int_to_ptr.hbm [resolvable:$true] %s24_s22 }
   0x9   :  { %64 = dma.hbm_to_vmem [thread:$0]  %s60_s18, 128, %s62_s8, [#allocation9]  }
   0xa   :  { %s45_s24 = sshll.u32 %s455_s2, 4  ;;  %s368_s25 = smov [#allocation3]   ;;  %s46_s24 = int_to_ptr.hbm [resolvable:$true] %s45_s24 }
   0xb   :  { %s26_s26 = sshll.u32 %s368_s25, 4  ;;  %s369_s3 = smov [#allocation7]   ;;  %s27_s26 = int_to_ptr.vmem [resolvable:$true] %s26_s26 }
   0xc   :  { %29 = dma.hbm_to_vmem [thread:$0]  %s25_s22, 128, %s27_s26, [#allocation4]  }
   0xd   :  { %s47_s27 = sshll.u32 %s369_s3, 4  ;;  %s370_s28 = smov 128   ;;  %s48_s27 = int_to_ptr.vmem [resolvable:$true] %s47_s27 }
   0xe   :  { %s371_s29 = smov 8   ;;  %s71_s10 = sshll.u32 %s458_s5, 4  ;;  %s72_s10 = int_to_ptr.hbm [resolvable:$true] %s71_s10 }
   0xf   :  { %53 = dma.hbm_to_vmem [thread:$0]  %s46_s24, 256, %s48_s27, [#allocation6], %s370_s28, %s370_s28, %s371_s29  }
  0x10   :  { %s372_s11 = smov [#allocation10]  }
  0x11   :  { %s73_s12 = sshll.u32 %s372_s11, 4  ;;  %s74_s12 = int_to_ptr.vmem [resolvable:$true] %s73_s12 }
  0x12   :  { %79 = dma.hbm_to_vmem [thread:$0]  %s72_s10, 2048, %s74_s12, [#allocation9], %s370_s28, %s370_s28, %s371_s29  }
  0x13   :  { %360 = dma.done.wait [#allocation4], 128  }
  0x14   :  { %361 = vsyncadd [#allocation4], 4294967168 }
  0x15   :  { %362 = dma.done.wait [#allocation6], 384  }
  0x16   :  { %363 = vsyncadd [#allocation6], 4294966912 }
  0x17   :  { %364 = dma.done.wait [#allocation9], 2176  }
  0x18   :  { %365 = vsyncadd [#allocation9], 4294965120  ;;  %vm111_vm0 = vcmask 64512   ;;  %v109_v1 = vld [vmem:[#allocation7 + $0x8] sm:$0xff]  ;;  %v110_v2 = vld [vmem:[#allocation8] sm:$0xff]  ;;  %vm135_vm1 = vcmask 130048  }
  0x19   :  { %v108_v3 = vld [vmem:[#allocation7] sm:$0xff]  ;;  %153 = vmatpush.msra.mxu1 %v109_v1  ;;  %130 = vmatpush.msra.mxu0 %v110_v2  ;;  %v107_v4 = vld [vmem:[#allocation5] sm:$0xff]  ;;  %v106_v5 = vld [vmem:[#allocation3] sm:$0xff]  ;;  %vm218_vm2 = vcmask 7168  }
  0x1a   :  { %v180_v6 = vld [vmem:[#allocation10 + $0x78] sm:$0xff]  ;;  %227 = vmatmul.msk.f32.vlgmr.msra.gmra.mxu0 %vm111_vm0, %v107_v4  ;;  %v179_v7 = vld [vmem:[#allocation10 + $0x70] sm:$0xff]  ;;  %v178_v8 = vld [vmem:[#allocation10 + $0x68] sm:$0xff] }
  0x1b   :  { %185 = vmatpush.msra.mxu2 %v180_v6  ;;  %154 = vmatpush.msra.mxu1 %v108_v3  ;;  %v177_v9 = vld [vmem:[#allocation10 + $0x60] sm:$0xff]  ;;  %v176_v10 = vld [vmem:[#allocation10 + $0x58] sm:$0xff]  ;;  %v175_v11 = vld [vmem:[#allocation10 + $0x50] sm:$0xff] }
  0x1c   :  { %228 = vmatmul.msk.f32.vlgmr.msra.gmra.mxu1 %vm135_vm1, %v106_v5  ;;  %v174_v12 = vld [vmem:[#allocation10 + $0x48] sm:$0xff]  ;;  %v173_v13 = vld [vmem:[#allocation10 + $0x40] sm:$0xff]  ;;  %v172_v14 = vld [vmem:[#allocation10 + $0x38] sm:$0xff] }
  0x1d   :  { %186 = vmatpush.msra.mxu2 %v179_v7  ;;  %v171_v15 = vld [vmem:[#allocation10 + $0x30] sm:$0xff]  ;;  %v170_v16 = vld [vmem:[#allocation10 + $0x28] sm:$0xff]  ;;  %v169_v17 = vld [vmem:[#allocation10 + $0x20] sm:$0xff] }
  0x1e   :  { %v168_v18 = vld [vmem:[#allocation10 + $0x18] sm:$0xff]  ;;  %v167_v19 = vld [vmem:[#allocation10 + $0x10] sm:$0xff]  ;;  %v166_v20 = vld [vmem:[#allocation10 + $0x8] sm:$0xff] }
  0x1f   :  { %187 = vmatpush.msra.mxu2 %v178_v8  ;;  %v165_v21 = vld [vmem:[#allocation10] sm:$0xff]  ;;  %v236_v23 = vld [vmem:[%s457_s4] ss:$0 sm:$0xff] }
  0x20   :  { %v237_v28 = vld [vmem:[%s459_s6] ss:$0 sm:$0xff] }
  0x21   :  { %188 = vmatpush.msra.mxu2 %v177_v9  ;;  %v238_v31 = vld [vmem:[%s460_s7] ss:$0 sm:$0xff] }
  0x22   :  { %v239_v34 = vld [vmem:[#allocation2] ss:$0 sm:$0xff] }
  0x23   :  { %189 = vmatpush.msra.mxu2 %v176_v10 }
  0x25   :  { %190 = vmatpush.msra.mxu2 %v175_v11 }
  0x27   :  { %191 = vmatpush.msra.mxu2 %v174_v12 }
  0x29   :  { %192 = vmatpush.msra.mxu2 %v173_v13 }
  0x2b   :  { %193 = vmatpush.msra.mxu2 %v172_v14 }
  0x2d   :  { %194 = vmatpush.msra.mxu2 %v171_v15 }
  0x2f   :  { %195 = vmatpush.msra.mxu2 %v170_v16 }
  0x31   :  { %196 = vmatpush.msra.mxu2 %v169_v17 }
  0x33   :  { %197 = vmatpush.msra.mxu2 %v168_v18 }
  0x35   :  { %198 = vmatpush.msra.mxu2 %v167_v19 }
  0x37   :  { %199 = vmatpush.msra.mxu2 %v166_v20 }
  0x39   :  { %200 = vmatpush.msra.mxu2 %v165_v21 }
  0x97   :  { %v132_v22 = vpop.f32.mrf.mxu0 }
  0x99   :  { %v156_v24 = vpop.f32.mrf.mxu1 }
  0x9a   :  { %v157_v25 = vadd.f32 %v156_v24, %v132_v22 }
  0x9c   :  { %v163_v26 = vadd.f32 %v236_v23, %v157_v25 }
  0x9e   :  { %v164_v27 = vmax.f32 %v163_v26, 0.0 }
  0xa0   :  { %201 = vmatmul.f32.vlgmr.msra.gmra.mxu2 %v164_v27 }
 0x123   :  { %v202_v29 = vpop.f32.mrf.mxu2 }
 0x124   :  { %v203_v30 = vadd.f32 %v237_v28, %v202_v29 }
 0x126   :  { %v205_v32 = vmax.f32 %v203_v30, 0.0 }
 0x128   :  { %v210_v33 = vmul.f32 %v238_v31, %v205_v32 }
 0x12a   :  { %211 = vadd.xlane.f32.xlu0 %v210_v33 }
 0x19d   :  { %v212_v35 = vpop.xlane.xlu0 %211 }
 0x19e   :  { %v217_v36 = vadd.f32 %v239_v34, %v212_v35 }
 0x1a0   :  { %219 = vst.msk [vmem:[%s462_s9] sm:$0xff] %vm218_vm2, %v217_v36 }
 0x1a1   :  { %224 = vsyncpa [#allocation4], 1 }
 0x1a2   :  { %225 = vsyncpa [#allocation6], 1 }
 0x1a3   :  { %226 = vsyncpa [#allocation9], 1 }

</bundles_post_ra>
